<compile_context>
chip_gen: v5e
topology: v5e:2x2
jax: 0.10.0
libtpu: 0.0.40
codegen_flags: <defaults>
</compile_context>

<pallas_src>
import jax
import jax.numpy as jnp
from jax import lax
from jax.experimental import pallas as pl
from jax.experimental.pallas import tpu as pltpu


NEG_SLOPE = 0.2  # assumed LeakyReLU slope for conv1's activation


def _residual_kernel(x_ref, w1b_ref, b1_ref, w2b_ref, b2_ref, o_ref,
                     xpad, ypad):
    """One batch element per grid step.

    x_ref   : (1, H, W*C)    input rows, channels-last, lane-dense
    w*b_ref : (3, W*C, W*C)  block-tridiagonal weights, one per vertical tap
    b*_ref  : (1, W*C)       biases tiled across width
    o_ref   : (1, H, W*C)    output rows
    xpad    : (H+2, W*C)     VMEM scratch: vertically zero-padded input
    ypad    : (H+2, W*C)     VMEM scratch: vertically zero-padded conv1 output
    """
    _, H, WC = o_ref.shape

    x = x_ref[0]                                     # (H, WC)
    zero_row = jnp.zeros((1, WC), jnp.float32)

    # ----- vertical zero-padding of the input (border rows only) ------------
    xpad[0:1, :] = zero_row
    xpad[H + 1:H + 2, :] = zero_row
    xpad[1:H + 1, :] = x

    # ----- conv1: 3 lane-dense matmuls, bias, LeakyReLU ----------------------
    acc1 = jnp.zeros((H, WC), jnp.float32)
    for dh in range(3):
        acc1 += jnp.dot(xpad[dh:dh + H, :], w1b_ref[dh],
                        preferred_element_type=jnp.float32)
    acc1 = acc1 + b1_ref[...]                        # (1, WC) broadcasts
    acc1 = jnp.where(acc1 > 0, acc1, NEG_SLOPE * acc1)

    # ----- vertical zero-padding of the intermediate -------------------------
    ypad[0:1, :] = zero_row
    ypad[H + 1:H + 2, :] = zero_row
    ypad[1:H + 1, :] = acc1

    # ----- conv2: 3 lane-dense matmuls, bias (no activation) -----------------
    acc2 = jnp.zeros((H, WC), jnp.float32)
    for dh in range(3):
        acc2 += jnp.dot(ypad[dh:dh + H, :], w2b_ref[dh],
                        preferred_element_type=jnp.float32)
    acc2 = acc2 + b2_ref[...]

    # ----- residual add + full-width (lane-dense) store -----------------------
    o_ref[0] = (x + acc2).astype(o_ref.dtype)


def _banded_weights(w_hwio, W):
    """HWIO (3,3,C,C) -> (3, W*C, W*C) block-tridiagonal per vertical tap.

    band[dh][w_in*C + ci, w_out*C + co] = w[dh, w_in - w_out + 1, ci, co],
    zero outside |w_in - w_out| <= 1.  Width padding is implicit in the band
    structure (edge columns simply lack the out-of-range off-diagonal block).
    """
    bands = []
    for dh in range(3):
        band = sum(
            jnp.kron(jnp.eye(W, k=1 - dw, dtype=jnp.float32),
                     w_hwio[dh, dw].astype(jnp.float32))
            for dw in range(3))
        bands.append(band)
    return jnp.stack(bands)                          # (3, W*C, W*C)


def residual_forward(x_nchw, w1, b1, w2, b2):
    """x_nchw: (N, C, H, W) float32.  Weights HWIO (3,3,C,C), biases (C,)."""
    N, C, H, W = x_nchw.shape
    WC = W * C

    # glue: NCHW -> NHWC -> (N, H, W*C) lane-dense rows (reshape is free).
    x_rows = jnp.transpose(x_nchw, (0, 2, 3, 1)).reshape(N, H, WC)

    # weight / bias prep (in a real model this is hoisted out of the hot loop).
    w1b = _banded_weights(w1, W)                     # (3, WC, WC)
    w2b = _banded_weights(w2, W)
    b1r = jnp.tile(b1, W).reshape(1, WC)             # index w*C+co -> b[co]
    b2r = jnp.tile(b2, W).reshape(1, WC)

    grid_spec = pltpu.PrefetchScalarGridSpec(
        num_scalar_prefetch=0,
        grid=(N,),
        in_specs=[
            pl.BlockSpec((1, H, WC), lambda n: (n, 0, 0)),
            pl.BlockSpec((3, WC, WC), lambda n: (0, 0, 0)),
            pl.BlockSpec((1, WC), lambda n: (0, 0)),
            pl.BlockSpec((3, WC, WC), lambda n: (0, 0, 0)),
            pl.BlockSpec((1, WC), lambda n: (0, 0)),
        ],
        out_specs=pl.BlockSpec((1, H, WC), lambda n: (n, 0, 0)),
        scratch_shapes=[pltpu.VMEM((H + 2, WC), jnp.float32),
                        pltpu.VMEM((H + 2, WC), jnp.float32)],
    )

    out_rows = pl.pallas_call(
        _residual_kernel,
        out_shape=jax.ShapeDtypeStruct((N, H, WC), jnp.float32),
        grid_spec=grid_spec,
        compiler_params=pltpu.CompilerParams(
            dimension_semantics=("parallel",)),      # megacore on v7x
    )(x_rows, w1b, b1r, w2b, b2r)

    # back to NCHW for the PyTorch-facing boundary.
    return jnp.transpose(out_rows.reshape(N, H, W, C), (0, 3, 1, 2))


def _reference(x_nchw, w1, b1, w2, b2):
    """Pure-JAX reference (NCHW conv via lax), for correctness checking."""
    def conv(x, w_hwio, b):
        y = lax.conv_general_dilated(
            x, w_hwio, window_strides=(1, 1), padding=((1, 1), (1, 1)),
            dimension_numbers=("NCHW", "HWIO", "NCHW"))
        return y + b.reshape(1, -1, 1, 1)

    y = conv(x_nchw, w1, b1)
    y = jnp.where(y > 0, y, NEG_SLOPE * y)
    y = conv(y, w2, b2)
    return x_nchw + y


if __name__ == "__main__":
    N, C, H, W = 2, 8, 16, 16     # W*C = 128 -> exactly one full lane width

    key = jax.random.PRNGKey(0)
    kx, k1, k2, k3, k4 = jax.random.split(key, 5)

    x = jax.random.normal(kx, (N, C, H, W), dtype=jnp.float32)
    # deterministic "Kaiming-ish" init, HWIO layout
    scale = 1.0 / jnp.sqrt(9.0 * C)
    w1 = jax.random.normal(k1, (3, 3, C, C), dtype=jnp.float32) * scale
    b1 = jax.random.normal(k2, (C,), dtype=jnp.float32) * 0.1
    w2 = jax.random.normal(k3, (3, 3, C, C), dtype=jnp.float32) * scale
    b2 = jax.random.normal(k4, (C,), dtype=jnp.float32) * 0.1

    out = residual_forward(x, w1, b1, w2, b2)
    out = jax.block_until_ready(out)

    ref = jax.block_until_ready(_reference(x, w1, b1, w2, b2))
    assert out.shape == (N, C, H, W)
    assert jnp.allclose(out, ref, atol=1e-4, rtol=1e-4), "mismatch vs reference"

    print("KERNEL_OK")
</pallas_src>

<mosaic_0001>
module attributes {stable_mosaic.version = 11 : i64} {
  func.func @_residual_kernel(%arg0: i32, %arg1: memref<1x16x128xf32, #tpu.memory_space<vmem>>, %arg2: memref<3x128x128xf32, #tpu.memory_space<vmem>>, %arg3: memref<1x128xf32, #tpu.memory_space<vmem>>, %arg4: memref<3x128x128xf32, #tpu.memory_space<vmem>>, %arg5: memref<1x128xf32, #tpu.memory_space<vmem>>, %arg6: memref<1x16x128xf32, #tpu.memory_space<vmem>>, %arg7: memref<18x128xf32, #tpu.memory_space<vmem>>, %arg8: memref<18x128xf32, #tpu.memory_space<vmem>>) attributes {dimension_semantics = [#tpu.dimension_semantics<parallel>], iteration_bounds = array<i64: 2>, scalar_prefetch = 0 : i64, scratch_operands = 2 : i64, tpu.core_type = #tpu.core_type<tc>, window_params = [{transform_indices = @transform_0, window_bounds = array<i64: 1, 16, 128>}, {pipeline_mode = #tpu.pipeline_mode<synchronous>, transform_indices = @transform_1, window_bounds = array<i64: 3, 128, 128>}, {pipeline_mode = #tpu.pipeline_mode<synchronous>, transform_indices = @transform_2, window_bounds = array<i64: 1, 128>}, {pipeline_mode = #tpu.pipeline_mode<synchronous>, transform_indices = @transform_3, window_bounds = array<i64: 3, 128, 128>}, {pipeline_mode = #tpu.pipeline_mode<synchronous>, transform_indices = @transform_4, window_bounds = array<i64: 1, 128>}, {transform_indices = @transform_5, window_bounds = array<i64: 1, 16, 128>}]} {
    %c0 = arith.constant 0 : index
    %c0_0 = arith.constant 0 : index
    %c0_1 = arith.constant 0 : index
    %0 = vector.load %arg1[%c0, %c0_0, %c0_1] : memref<1x16x128xf32, #tpu.memory_space<vmem>>, vector<1x16x128xf32>
    %1 = vector.shape_cast %0 : vector<1x16x128xf32> to vector<16x128xf32>
    %cst = arith.constant 0.000000e+00 : f32
    %2 = vector.broadcast %cst : f32 to vector<1x128xf32>
    %c0_2 = arith.constant 0 : index
    %c0_3 = arith.constant 0 : index
    %3 = vector.load %arg7[%c0_2, %c0_3] : memref<18x128xf32, #tpu.memory_space<vmem>>, vector<1x128xf32>
    tpu.vector_store %arg7[%c0_2, %c0_3], %2 {strides = array<i32>} : memref<18x128xf32, #tpu.memory_space<vmem>>, vector<1x128xf32>,
    %c17 = arith.constant 17 : index
    %c0_4 = arith.constant 0 : index
    %4 = vector.load %arg7[%c17, %c0_4] : memref<18x128xf32, #tpu.memory_space<vmem>>, vector<1x128xf32>
    tpu.vector_store %arg7[%c17, %c0_4], %2 {strides = array<i32>} : memref<18x128xf32, #tpu.memory_space<vmem>>, vector<1x128xf32>,
    %c1 = arith.constant 1 : index
    %c0_5 = arith.constant 0 : index
    %5 = vector.load %arg7[%c1, %c0_5] : memref<18x128xf32, #tpu.memory_space<vmem>>, vector<16x128xf32>
    tpu.vector_store %arg7[%c1, %c0_5], %1 {strides = array<i32>} : memref<18x128xf32, #tpu.memory_space<vmem>>, vector<16x128xf32>,
    %cst_6 = arith.constant 0.000000e+00 : f32
    %6 = vector.broadcast %cst_6 : f32 to vector<16x128xf32>
    %c0_7 = arith.constant 0 : index
    %c0_8 = arith.constant 0 : index
    %7 = vector.load %arg7[%c0_7, %c0_8] : memref<18x128xf32, #tpu.memory_space<vmem>>, vector<16x128xf32>
    %c0_9 = arith.constant 0 : index
    %c0_10 = arith.constant 0 : index
    %c0_11 = arith.constant 0 : index
    %8 = vector.load %arg2[%c0_9, %c0_10, %c0_11] : memref<3x128x128xf32, #tpu.memory_space<vmem>>, vector<1x128x128xf32>
    %9 = vector.shape_cast %8 : vector<1x128x128xf32> to vector<128x128xf32>
    %cst_12 = arith.constant dense<0.000000e+00> : vector<16x128xf32>
    %10 = tpu.matmul %7, %9, %cst_12 {dimension_numbers = #tpu.dot_dimension_numbers<[1], [0], [0], [1], [0, 0, 1, 1], [], []>} : vector<16x128xf32>, vector<128x128xf32>, vector<16x128xf32> -> vector<16x128xf32>
    %11 = arith.addf %6, %10 : vector<16x128xf32>
    %c1_13 = arith.constant 1 : index
    %c0_14 = arith.constant 0 : index
    %12 = vector.load %arg7[%c1_13, %c0_14] : memref<18x128xf32, #tpu.memory_space<vmem>>, vector<16x128xf32>
    %c1_15 = arith.constant 1 : index
    %c0_16 = arith.constant 0 : index
    %c0_17 = arith.constant 0 : index
    %13 = vector.load %arg2[%c1_15, %c0_16, %c0_17] : memref<3x128x128xf32, #tpu.memory_space<vmem>>, vector<1x128x128xf32>
    %14 = vector.shape_cast %13 : vector<1x128x128xf32> to vector<128x128xf32>
    %cst_18 = arith.constant dense<0.000000e+00> : vector<16x128xf32>
    %15 = tpu.matmul %12, %14, %cst_18 {dimension_numbers = #tpu.dot_dimension_numbers<[1], [0], [0], [1], [0, 0, 1, 1], [], []>} : vector<16x128xf32>, vector<128x128xf32>, vector<16x128xf32> -> vector<16x128xf32>
    %16 = arith.addf %11, %15 : vector<16x128xf32>
    %c2 = arith.constant 2 : index
    %c0_19 = arith.constant 0 : index
    %17 = vector.load %arg7[%c2, %c0_19] : memref<18x128xf32, #tpu.memory_space<vmem>>, vector<16x128xf32>
    %c2_20 = arith.constant 2 : index
    %c0_21 = arith.constant 0 : index
    %c0_22 = arith.constant 0 : index
    %18 = vector.load %arg2[%c2_20, %c0_21, %c0_22] : memref<3x128x128xf32, #tpu.memory_space<vmem>>, vector<1x128x128xf32>
    %19 = vector.shape_cast %18 : vector<1x128x128xf32> to vector<128x128xf32>
    %cst_23 = arith.constant dense<0.000000e+00> : vector<16x128xf32>
    %20 = tpu.matmul %17, %19, %cst_23 {dimension_numbers = #tpu.dot_dimension_numbers<[1], [0], [0], [1], [0, 0, 1, 1], [], []>} : vector<16x128xf32>, vector<128x128xf32>, vector<16x128xf32> -> vector<16x128xf32>
    %21 = arith.addf %16, %20 : vector<16x128xf32>
    %c0_24 = arith.constant 0 : index
    %c0_25 = arith.constant 0 : index
    %22 = vector.load %arg3[%c0_24, %c0_25] : memref<1x128xf32, #tpu.memory_space<vmem>>, vector<1x128xf32>
    %23 = vector.broadcast %22 : vector<1x128xf32> to vector<16x128xf32>
    %24 = arith.addf %21, %23 : vector<16x128xf32>
    %cst_26 = arith.constant 0.000000e+00 : f32
    %25 = vector.broadcast %cst_26 : f32 to vector<16x128xf32>
    %26 = arith.cmpf ogt, %24, %25 : vector<16x128xf32>
    %cst_27 = arith.constant 2.000000e-01 : f32
    %27 = vector.broadcast %cst_27 : f32 to vector<16x128xf32>
    %28 = arith.mulf %27, %24 : vector<16x128xf32>
    %29 = arith.select %26, %24, %28 : vector<16x128xi1>, vector<16x128xf32>
    %c0_28 = arith.constant 0 : index
    %c0_29 = arith.constant 0 : index
    %30 = vector.load %arg8[%c0_28, %c0_29] : memref<18x128xf32, #tpu.memory_space<vmem>>, vector<1x128xf32>
    tpu.vector_store %arg8[%c0_28, %c0_29], %2 {strides = array<i32>} : memref<18x128xf32, #tpu.memory_space<vmem>>, vector<1x128xf32>,
    %c17_30 = arith.constant 17 : index
    %c0_31 = arith.constant 0 : index
    %31 = vector.load %arg8[%c17_30, %c0_31] : memref<18x128xf32, #tpu.memory_space<vmem>>, vector<1x128xf32>
    tpu.vector_store %arg8[%c17_30, %c0_31], %2 {strides = array<i32>} : memref<18x128xf32, #tpu.memory_space<vmem>>, vector<1x128xf32>,
    %c1_32 = arith.constant 1 : index
    %c0_33 = arith.constant 0 : index
    %32 = vector.load %arg8[%c1_32, %c0_33] : memref<18x128xf32, #tpu.memory_space<vmem>>, vector<16x128xf32>
    tpu.vector_store %arg8[%c1_32, %c0_33], %29 {strides = array<i32>} : memref<18x128xf32, #tpu.memory_space<vmem>>, vector<16x128xf32>,
    %cst_34 = arith.constant 0.000000e+00 : f32
    %33 = vector.broadcast %cst_34 : f32 to vector<16x128xf32>
    %c0_35 = arith.constant 0 : index
    %c0_36 = arith.constant 0 : index
    %34 = vector.load %arg8[%c0_35, %c0_36] : memref<18x128xf32, #tpu.memory_space<vmem>>, vector<16x128xf32>
    %c0_37 = arith.constant 0 : index
    %c0_38 = arith.constant 0 : index
    %c0_39 = arith.constant 0 : index
    %35 = vector.load %arg4[%c0_37, %c0_38, %c0_39] : memref<3x128x128xf32, #tpu.memory_space<vmem>>, vector<1x128x128xf32>
    %36 = vector.shape_cast %35 : vector<1x128x128xf32> to vector<128x128xf32>
    %cst_40 = arith.constant dense<0.000000e+00> : vector<16x128xf32>
    %37 = tpu.matmul %34, %36, %cst_40 {dimension_numbers = #tpu.dot_dimension_numbers<[1], [0], [0], [1], [0, 0, 1, 1], [], []>} : vector<16x128xf32>, vector<128x128xf32>, vector<16x128xf32> -> vector<16x128xf32>
    %38 = arith.addf %33, %37 : vector<16x128xf32>
    %c1_41 = arith.constant 1 : index
    %c0_42 = arith.constant 0 : index
    %39 = vector.load %arg8[%c1_41, %c0_42] : memref<18x128xf32, #tpu.memory_space<vmem>>, vector<16x128xf32>
    %c1_43 = arith.constant 1 : index
    %c0_44 = arith.constant 0 : index
    %c0_45 = arith.constant 0 : index
    %40 = vector.load %arg4[%c1_43, %c0_44, %c0_45] : memref<3x128x128xf32, #tpu.memory_space<vmem>>, vector<1x128x128xf32>
    %41 = vector.shape_cast %40 : vector<1x128x128xf32> to vector<128x128xf32>
    %cst_46 = arith.constant dense<0.000000e+00> : vector<16x128xf32>
    %42 = tpu.matmul %39, %41, %cst_46 {dimension_numbers = #tpu.dot_dimension_numbers<[1], [0], [0], [1], [0, 0, 1, 1], [], []>} : vector<16x128xf32>, vector<128x128xf32>, vector<16x128xf32> -> vector<16x128xf32>
    %43 = arith.addf %38, %42 : vector<16x128xf32>
    %c2_47 = arith.constant 2 : index
    %c0_48 = arith.constant 0 : index
    %44 = vector.load %arg8[%c2_47, %c0_48] : memref<18x128xf32, #tpu.memory_space<vmem>>, vector<16x128xf32>
    %c2_49 = arith.constant 2 : index
    %c0_50 = arith.constant 0 : index
    %c0_51 = arith.constant 0 : index
    %45 = vector.load %arg4[%c2_49, %c0_50, %c0_51] : memref<3x128x128xf32, #tpu.memory_space<vmem>>, vector<1x128x128xf32>
    %46 = vector.shape_cast %45 : vector<1x128x128xf32> to vector<128x128xf32>
    %cst_52 = arith.constant dense<0.000000e+00> : vector<16x128xf32>
    %47 = tpu.matmul %44, %46, %cst_52 {dimension_numbers = #tpu.dot_dimension_numbers<[1], [0], [0], [1], [0, 0, 1, 1], [], []>} : vector<16x128xf32>, vector<128x128xf32>, vector<16x128xf32> -> vector<16x128xf32>
    %48 = arith.addf %43, %47 : vector<16x128xf32>
    %c0_53 = arith.constant 0 : index
    %c0_54 = arith.constant 0 : index
    %49 = vector.load %arg5[%c0_53, %c0_54] : memref<1x128xf32, #tpu.memory_space<vmem>>, vector<1x128xf32>
    %50 = vector.broadcast %49 : vector<1x128xf32> to vector<16x128xf32>
    %51 = arith.addf %48, %50 : vector<16x128xf32>
    %52 = arith.addf %1, %51 : vector<16x128xf32>
    %c0_55 = arith.constant 0 : index
    %c0_56 = arith.constant 0 : index
    %c0_57 = arith.constant 0 : index
    %53 = vector.load %arg6[%c0_55, %c0_56, %c0_57] : memref<1x16x128xf32, #tpu.memory_space<vmem>>, vector<1x16x128xf32>
    %54 = vector.shape_cast %53 : vector<1x16x128xf32> to vector<16x128xf32>
    %55 = vector.shape_cast %52 : vector<16x128xf32> to vector<1x16x128xf32>
    tpu.vector_store %arg6[%c0_55, %c0_56, %c0_57], %55 {strides = array<i32>} : memref<1x16x128xf32, #tpu.memory_space<vmem>>, vector<1x16x128xf32>,
    return
  }
  func.func @transform_0(%arg0: i32) -> (i32, i32, i32) {
    %c0_i32 = arith.constant 0 : i32
    %c0_i32_0 = arith.constant 0 : i32
    %c0_i32_1 = arith.constant 0 : i32
    return %arg0, %c0_i32, %c0_i32_0 : i32, i32, i32
  }
  func.func @transform_1(%arg0: i32) -> (i32, i32, i32) {
    %c0_i32 = arith.constant 0 : i32
    %c0_i32_0 = arith.constant 0 : i32
    %c0_i32_1 = arith.constant 0 : i32
    %c0_i32_2 = arith.constant 0 : i32
    return %c0_i32, %c0_i32_0, %c0_i32_1 : i32, i32, i32
  }
  func.func @transform_2(%arg0: i32) -> (i32, i32) {
    %c0_i32 = arith.constant 0 : i32
    %c0_i32_0 = arith.constant 0 : i32
    %c0_i32_1 = arith.constant 0 : i32
    return %c0_i32, %c0_i32_0 : i32, i32
  }
  func.func @transform_3(%arg0: i32) -> (i32, i32, i32) {
    %c0_i32 = arith.constant 0 : i32
    %c0_i32_0 = arith.constant 0 : i32
    %c0_i32_1 = arith.constant 0 : i32
    %c0_i32_2 = arith.constant 0 : i32
    return %c0_i32, %c0_i32_0, %c0_i32_1 : i32, i32, i32
  }
  func.func @transform_4(%arg0: i32) -> (i32, i32) {
    %c0_i32 = arith.constant 0 : i32
    %c0_i32_0 = arith.constant 0 : i32
    %c0_i32_1 = arith.constant 0 : i32
    return %c0_i32, %c0_i32_0 : i32, i32
  }
  func.func @transform_5(%arg0: i32) -> (i32, i32, i32) {
    %c0_i32 = arith.constant 0 : i32
    %c0_i32_0 = arith.constant 0 : i32
    %c0_i32_1 = arith.constant 0 : i32
    return %arg0, %c0_i32, %c0_i32_0 : i32, i32, i32
  }
}

</mosaic_0001>

<bundles_post_ra>
// kernel: tpu_custom_call.1
= control target key start
LH: loop header
LB: loop body
LE: loop exit
PB: predicated region body
PF: predicated region fallthrough
CT: control target
= control target key end

     0   :  { %10 = vsyncpa [#allocation5], 0  ;;  %s1171_s0 = inlined_call_operand.hbm [shape: f32[2,16,128], index: 0, kind: input, shape index: {}]   ;;  %s1172_s1 = inlined_call_operand.hbm [shape: f32[3,128,128], index: 1, kind: input, shape index: {}]   ;;  %s1173_s2 = inlined_call_operand.vmem [shape: f32[1,128], index: 2, kind: input, shape index: {}]   ;;  %s1174_s3 = inlined_call_operand.hbm [shape: f32[3,128,128], index: 3, kind: input, shape index: {}]   ;;  %s1175_s4 = inlined_call_operand.vmem [shape: f32[1,128], index: 4, kind: input, shape index: {}]   ;;  %s1176_s5 = inlined_call_operand.hbm [shape: f32[2,16,128], index: 5, kind: output, shape index: {}]  }
   0x1   :  { %12 = vsyncpa [#allocation5 + $0x1], 0 }
   0x2   :  { %13 = vsyncpa [#allocation8], 0 }
   0x3   :  { %14 = vsyncpa [#allocation6], 0 }
   0x4   :  { %16 = vsyncpa [#allocation6 + $0x1], 0  ;;  %s997_s18 = smov 0   ;;  %s999_s19 = smov 0  }
   0x5   :  { %s1001_s20 = smov 0   ;;  %s1003_s21 = smov 0  }
   0x6 LB: > { %s1018_s22 = sadd.s32 4294967295, %s958_s21   ;;  %s672_s23 = sadd.s32 4294967294, %s958_s21   ;;  %s958_s21 = sphi %s1003_s21, %s1188_s21   ;;  %s954_s20 = sphi %s1001_s20, %s1187_s20   ;;  %s950_s19 = sphi %s999_s19, %s1186_s19   ;;  %s946_s18 = sphi %s997_s18, %s1185_s18  }
   0x7   : > { %p42_p0 = scmp.ne.s32.totalorder %s950_s19, %s946_s18  ;;  %p43_p1 = scmp.eq.s32.totalorder %s1018_s22, 0 }
   0x8   : > { %p150_p2 = scmp.eq.s32.totalorder %s1018_s22, 1  ;;  %p156_p3 = scmp.eq.s32.totalorder %s672_s23, 1 }
   0x9   : > { %p1027_p4 = por %p43_p1, %p42_p0  ;;  %p673_p5 = scmp.ge.s32.totalorder %s958_s21, 1 }
   0xa   : > { %p1032_p6 = por %p156_p3, %p42_p0  ;;  %p163_p7 = scmp.lt.s32.totalorder %s958_s21, 3 }
   0xb   : > { %s174_s28 = sshll.u32 %s1172_s1, 4  ;;  %s960_s30 = smov [#allocation7]   ;;  %s175_s28 = int_to_ptr.hbm [resolvable:$true] %s174_s28 }
   0xc   : > { %p1040_p8 = pnand %p673_p5, %p163_p7  ;;  %s176_s6 = sshll.u32 %s960_s30, 4  ;;  %s177_s6 = int_to_ptr.vmem [resolvable:$true] %s176_s6 }
   0xd   : > { %s191_s9 = sshll.u32 %s1174_s3, 4  ;;  %s1177_s10 = smov 128   ;;  %s192_s9 = int_to_ptr.hbm [resolvable:$true] %s191_s9 }
   0xe   : > { %p736_p9 = pneg %p1040_p8  ;;  %s962_s11 = smov 8  }
   0xf   : > { %s963_s12 = smov [#allocation9]   ;;  %s1059_s14 = sadd.s32 1, %s958_s21  }
  0x10   : > { %p737_p10 = pnand %p736_p9, %p43_p1  ;;  %s193_s13 = sshll.u32 %s963_s12, 4  ;;  %s194_s13 = int_to_ptr.vmem [resolvable:$true] %s193_s13 }
  0x11   : > { %s29_s15 = sadd.s32 1, %s954_s20  ;;  %s26_s16 = ssub.s32 %s958_s21, %s1059_s14 }
  0x12   : > { %739 = dma.hbm_to_vmem [thread:$0]  (!%p737_p10), %s175_s28, 6144, %s177_s6, [#allocation8], %s1177_s10, %s1177_s10, %s962_s11  }
  0x13   : > { %742 = dma.hbm_to_vmem [thread:$0]  (!%p737_p10), %s192_s9, 6144, %s194_s13, [#allocation8], %s1177_s10, %s1177_s10, %s962_s11  }
  0x14   : > { %p36_p12 = scmp.ne.s32.totalorder %s954_s20, %s950_s19  ;;  %p27_p13 = scmp.eq.s32.totalorder %s26_s16, 0 }
  0x15   : > { %p37_p0 = scmp.eq.s32.totalorder %s958_s21, 0  ;;  %p753_p5 = scmp.lt.s32.totalorder %s958_s21, 2 }
  0x16   : > { %p1069_p3 = por %p150_p2, %p36_p12  ;;  %s210_s26 = sand.u32 1, %s954_s20  }
  0x17   : > { %s1075_s23 = scalar_select %p27_p13, %s954_s20, %s29_s15  }
  0x18   : > { %p38_p7 = por %p37_p0, %p36_p12  ;;  %s677_s27 = sshll.u32 %s210_s26, 4 }
  0x19   : > { %s690_s28 = sshll.u32 %s958_s21, 4  ;;  %s214_s8 = scalar_lea.vmem [#allocation4], %s677_s27 }
  0x1a   : > { %s219_s7 = scalar_lea.hbm %s1171_s0, %s690_s28  ;;  %s222_s9 = sshll.u32 %s214_s8, 4  ;;  %s223_s9 = int_to_ptr.vmem [resolvable:$true] %s222_s9 }
  0x1b   : > { %s220_s12 = sshll.u32 %s219_s7, 4  ;;  %p1082_p2 = pnand %p753_p5, %p38_p7  ;;  %s221_s12 = int_to_ptr.hbm [resolvable:$true] %s220_s12 }
  0x1c   : > { %s211_s15 = scalar_lea.sflag [#allocation5], %s210_s26  ;;  %s858_s16 = sshra.s32 %s221_s12, 4  ;;  %s859_s16 = int_to_ptr.hbm [resolvable:$true] %s858_s16 }
  0x1d   : > { %s860_s10 = scalar_lea.hbm %s859_s16, 16  ;;  %p862_p10 = pneg %p1082_p2 }
  0x1e   : > { %p861_p9 = scmp.ne.s32.totalorder %s859_s16, %s860_s10  ;;  %s865_s30 = scalar_lea.hbm %s1171_s0, 32 }
  0x1f   : > { %p866_p0 = scmp.lt.s32.totalorder %s859_s16, %s1171_s0  ;;  %p867_p5 = scmp.lt.s32.totalorder %s865_s30, %s860_s10 }
  0x20   : > { %p863_p12 = pnand %p862_p10, %p861_p9 }
  0x21   : > { %p868_p7 = por %p867_p5, %p866_p0 }
  0x22   : > { %p864_p13 = pneg %p863_p12 }
  0x24   : > { %p869_p11 = pnand %p868_p7, %p864_p13 }
  0x26   : > { %872 = shalt.err (!%p869_p11)
}
  0x27   : > { %s1183_s26 = smov 128   ;;  %234 = sbr.rel (%p1040_p8) target bundleno = 378 (0x17a), region = 40 }
  0x28   : > { %746 = dma.hbm_to_vmem [thread:$0]  (!%p1082_p2), %s221_s12, 256, %s223_s9, %s211_s15, %s1183_s26, %s1183_s26, %s962_s11  }
  0x29   : > { %s1102_s8 = sand.u32 (!%p1040_p8), 1, %s950_s19  }
  0x2a   : > { %s681_s10 = sshll.u32 (!%p1040_p8), %s1102_s8, 4  ;;  %s237_s16 = scalar_lea.sflag (!%p1040_p8), [#allocation5], %s1102_s8 }
  0x2b   : > { %s1108_s28 = scalar_lea.vmem (!%p1040_p8), [#allocation4], %s681_s10 }
  0x2c   : > { %933 = dma.done.wait (%p1027_p4), %s237_s16, 256  }
  0x2d   : > { %935 = vsyncadd (%p1027_p4), %s237_s16, 4294967040 }
  0x2e   : > { %937 = dma.done.wait (%p43_p1), [#allocation8], 12288  }
  0x2f   : > { %939 = vsyncadd (%p43_p1), [#allocation8], 4294955008  ;;  %v964_v0 = vmov 0.0   ;;  %v385_v1 = vld [vmem:[#allocation7 + $0x178] sm:$0xff]  ;;  %v384_v2 = vld [vmem:[#allocation7 + $0x170] sm:$0xff]  ;;  %s691_s12 = sshll.u32 %s1018_s22, 4 }
  0x30   : > { %280 = vst [vmem:[#allocation2] sm:$0x1] %v964_v0  ;;  %v320_v3 = vld [vmem:[#allocation7 + $0xf8] sm:$0xff]  ;;  %386 = vmatpush.msra.mxu2 %v385_v1  ;;  %v319_v5 = vld [vmem:[#allocation7 + $0xf0] sm:$0xff]  ;;  %v383_v6 = vld [vmem:[#allocation7 + $0x168] sm:$0xff]  ;;  %s576_s27 = scalar_lea.hbm %s1176_s5, %s691_s12  ;;  %s277_s30 = scalar_lea.vmem [#allocation10], %s681_s10 }
  0x31   : > { %281 = vst [vmem:[#allocation2 + $0x11] sm:$0x1] %v964_v0  ;;  %321 = vmatpush.msra.mxu0 %v320_v3  ;;  %v301_v4 = vld [vmem:[#allocation7 + $0x78] sm:$0xff]  ;;  %v300_v7 = vld [vmem:[#allocation7 + $0x70] sm:$0xff]  ;;  %v318_v8 = vld [vmem:[#allocation7 + $0xe8] sm:$0xff]  ;;  %s577_s6 = sshll.u32 %s277_s30, 4  ;;  %s578_s6 = int_to_ptr.vmem [resolvable:$true] %s577_s6 }
  0x32   : > { %423 = vst [vmem:[#allocation3] sm:$0x1] %v964_v0  ;;  %344 = vmatpush.msra.mxu1 %v301_v4  ;;  %387 = vmatpush.msra.mxu2 %v384_v2  ;;  %v299_v9 = vld [vmem:[#allocation7 + $0x68] sm:$0xff]  ;;  %v382_v10 = vld [vmem:[#allocation7 + $0x160] sm:$0xff]  ;;  %v381_v13 = vld [vmem:[#allocation7 + $0x158] sm:$0xff]  ;;  %s579_s7 = sshll.u32 %s576_s27, 4  ;;  %s580_s7 = int_to_ptr.hbm [resolvable:$true] %s579_s7 }
  0x33   : > { %424 = vst [vmem:[#allocation3 + $0x11] sm:$0x1] %v964_v0  ;;  %322 = vmatpush.msra.mxu0 %v319_v5  ;;  %v317_v11 = vld [vmem:[#allocation7 + $0xe0] sm:$0xff]  ;;  %v316_v14 = vld [vmem:[#allocation7 + $0xd8] sm:$0xff]  ;;  %v380_v16 = vld [vmem:[#allocation7 + $0x150] sm:$0xff]  ;;  %s565_s22 = scalar_lea.sflag [#allocation6], %s1102_s8 }
  0x34   : > { %345 = vmatpush.msra.mxu1 %v300_v7  ;;  %388 = vmatpush.msra.mxu2 %v383_v6  ;;  %v298_v12 = vld [vmem:[#allocation7 + $0x60] sm:$0xff]  ;;  %v297_v15 = vld [vmem:[#allocation7 + $0x58] sm:$0xff]  ;;  %v315_v17 = vld [vmem:[#allocation7 + $0xd0] sm:$0xff]  ;;  %s902_s26 = sshra.s32 %s580_s7, 4  ;;  %s908_s24 = scalar_lea.hbm %s1176_s5, 32  ;;  %s903_s26 = int_to_ptr.hbm [resolvable:$true] %s902_s26 }
  0x35   : > { %323 = vmatpush.msra.mxu0 %v318_v8  ;;  %v296_v18 = vld [vmem:[#allocation7 + $0x50] sm:$0xff]  ;;  %v379_v19 = vld [vmem:[#allocation7 + $0x148] sm:$0xff]  ;;  %v378_v22 = vld [vmem:[#allocation7 + $0x140] sm:$0xff]  ;;  %s904_s16 = scalar_lea.hbm %s903_s26, 16  ;;  %p909_p11 = scmp.lt.s32.totalorder %s903_s26, %s1176_s5 }
  0x36   : > { %346 = vmatpush.msra.mxu1 %v299_v9  ;;  %389 = vmatpush.msra.mxu2 %v382_v10  ;;  %v314_v20 = vld [vmem:[#allocation7 + $0xc8] sm:$0xff]  ;;  %v313_v23 = vld [vmem:[#allocation7 + $0xc0] sm:$0xff]  ;;  %v377_v25 = vld [vmem:[#allocation7 + $0x138] sm:$0xff]  ;;  %p905_p1 = scmp.ne.s32.totalorder %s903_s26, %s904_s16  ;;  %p910_p2 = scmp.lt.s32.totalorder %s908_s24, %s904_s16 }
  0x37   : > { %324 = vmatpush.msra.mxu0 %v317_v11  ;;  %v295_v21 = vld [vmem:[#allocation7 + $0x48] sm:$0xff]  ;;  %v294_v24 = vld [vmem:[#allocation7 + $0x40] sm:$0xff]  ;;  %v312_v26 = vld [vmem:[#allocation7 + $0xb8] sm:$0xff] }
  0x38   : > { %347 = vmatpush.msra.mxu1 %v298_v12  ;;  %390 = vmatpush.msra.mxu2 %v381_v13  ;;  %v1119_v27 = vld [vmem:[%s1108_s28] sm:$0xff]  ;;  %v293_v28 = vld [vmem:[#allocation7 + $0x38] sm:$0xff]  ;;  %v375_v35 = vld [vmem:[#allocation7 + $0x128] sm:$0xff]  ;;  %p906_p4 = pnand %p905_p1, %p1069_p3  ;;  %p911_p9 = por %p910_p2, %p909_p11 }
  0x39   : > { %325 = vmatpush.msra.mxu0 %v316_v14  ;;  %v1122_v29 = vld [vmem:[%s1108_s28 + $0x8] sm:$0xff]  ;;  %282 = vst [vmem:[#allocation2 + $0x1] sm:$0xff] %v1119_v27  ;;  %v376_v30 = vld [vmem:[#allocation7 + $0x130] sm:$0xff]  ;;  %v374_v39 = vld [vmem:[#allocation7 + $0x120] sm:$0xff] }
  0x3a   : > { %348 = vmatpush.msra.mxu1 %v297_v15  ;;  %391 = vmatpush.msra.mxu2 %v380_v16  ;;  %v311_v31 = vld [vmem:[#allocation7 + $0xb0] sm:$0xff]  ;;  %283 = vst [vmem:[#allocation2 + $0x9] sm:$0xff] %v1122_v29  ;;  %v463_v32 = vld [vmem:[#allocation9 + $0xf8] sm:$0xff]  ;;  %v310_v36 = vld [vmem:[#allocation7 + $0xa8] sm:$0xff]  ;;  %p907_p8 = pneg %p906_p4 }
  0x3b   : > { %326 = vmatpush.msra.mxu0 %v315_v17  ;;  %v292_v33 = vld [vmem:[#allocation7 + $0x30] sm:$0xff]  ;;  %464 = vmatpush.msra.mxu3 %v463_v32  ;;  %v291_v37 = vld [vmem:[#allocation7 + $0x28] sm:$0xff]  ;;  %v309_v40 = vld [vmem:[#allocation7 + $0xa0] sm:$0xff] }
  0x3c   : > { %349 = vmatpush.msra.mxu1 %v296_v18  ;;  %392 = vmatpush.msra.mxu2 %v379_v19  ;;  %v462_v34 = vld [vmem:[#allocation9 + $0xf0] sm:$0xff]  ;;  %v461_v38 = vld [vmem:[#allocation9 + $0xe8] sm:$0xff]  ;;  %v290_v41 = vld [vmem:[#allocation7 + $0x20] sm:$0xff]  ;;  %p912_p10 = pnand %p911_p9, %p907_p8 }
  0x3d   : > { %327 = vmatpush.msra.mxu0 %v314_v20  ;;  %465 = vmatpush.msra.mxu3 %v462_v34  ;;  %v460_v42 = vld [vmem:[#allocation9 + $0xe0] sm:$0xff]  ;;  %v373_v43 = vld [vmem:[#allocation7 + $0x118] sm:$0xff]  ;;  %v372_v47 = vld [vmem:[#allocation7 + $0x110] sm:$0xff] }
  0x3e   : > { %350 = vmatpush.msra.mxu1 %v295_v21  ;;  %393 = vmatpush.msra.mxu2 %v378_v22  ;;  %v308_v44 = vld [vmem:[#allocation7 + $0x98] sm:$0xff]  ;;  %v307_v48 = vld [vmem:[#allocation7 + $0x90] sm:$0xff]  ;;  %v371_v49 = vld [vmem:[#allocation7 + $0x108] sm:$0xff] }
  0x3f   : > { %328 = vmatpush.msra.mxu0 %v313_v23  ;;  %466 = vmatpush.msra.mxu3 %v461_v38  ;;  %v289_v45 = vld [vmem:[#allocation7 + $0x18] sm:$0xff]  ;;  %v288_v50 = vld [vmem:[#allocation7 + $0x10] sm:$0xff]  ;;  %v306_v52 = vld [vmem:[#allocation7 + $0x88] sm:$0xff] }
  0x40   : > { %351 = vmatpush.msra.mxu1 %v294_v24  ;;  %394 = vmatpush.msra.mxu2 %v377_v25  ;;  %v459_v46 = vld [vmem:[#allocation9 + $0xd8] sm:$0xff]  ;;  %v458_v51 = vld [vmem:[#allocation9 + $0xd0] sm:$0xff]  ;;  %v287_v53 = vld [vmem:[#allocation7 + $0x8] sm:$0xff] }
  0x41   : > { %329 = vmatpush.msra.mxu0 %v312_v26  ;;  %467 = vmatpush.msra.mxu3 %v460_v42  ;;  %v457_v54 = vld [vmem:[#allocation9 + $0xc8] sm:$0xff]  ;;  %v370_v55 = vld [vmem:[#allocation7 + $0x100] sm:$0xff]  ;;  %v367_v57 = vld [vmem:[#allocation2 + $0x2] sm:$0xff] }
  0x42   : > { %352 = vmatpush.msra.mxu1 %v293_v28  ;;  %395 = vmatpush.msra.mxu2 %v376_v30  ;;  %v305_v56 = vld [vmem:[#allocation7 + $0x80] sm:$0xff]  ;;  %v284_v59 = vld [vmem:[#allocation2] sm:$0xff]  ;;  %v444_v61 = vld [vmem:[#allocation9 + $0x78] sm:$0xff] }
  0x43   : > { %330 = vmatpush.msra.mxu0 %v311_v31  ;;  %468 = vmatpush.msra.mxu3 %v459_v46  ;;  %v286_v58 = vld [vmem:[#allocation7] sm:$0xff]  ;;  %v528_v62 = vld [vmem:[#allocation9 + $0x178] sm:$0xff]  ;;  %v443_v0 = vld [vmem:[#allocation9 + $0x70] sm:$0xff] }
  0x44   : > { %353 = vmatpush.msra.mxu1 %v292_v33  ;;  %396 = vmatpush.msra.mxu2 %v375_v35  ;;  %v456_v60 = vld [vmem:[#allocation9 + $0xc0] sm:$0xff]  ;;  %v455_v63 = vld [vmem:[#allocation9 + $0xb8] sm:$0xff]  ;;  %v527_v1 = vld [vmem:[#allocation9 + $0x170] sm:$0xff] }
  0x45   : > { %331 = vmatpush.msra.mxu0 %v310_v36  ;;  %469 = vmatpush.msra.mxu3 %v458_v51  ;;  %v454_v2 = vld [vmem:[#allocation9 + $0xb0] sm:$0xff]  ;;  %v442_v3 = vld [vmem:[#allocation9 + $0x68] sm:$0xff]  ;;  %v368_v5 = vld [vmem:[#allocation2 + $0xa] sm:$0xff] }
  0x46   : > { %354 = vmatpush.msra.mxu1 %v291_v37  ;;  %397 = vmatpush.msra.mxu2 %v374_v39  ;;  %v526_v4 = vld [vmem:[#allocation9 + $0x168] sm:$0xff]  ;;  %v285_v7 = vld [vmem:[#allocation2 + $0x8] sm:$0xff]  ;;  %v441_v8 = vld [vmem:[#allocation9 + $0x60] sm:$0xff] }
  0x47   : > { %332 = vmatpush.msra.mxu0 %v309_v40  ;;  %470 = vmatpush.msra.mxu3 %v457_v54  ;;  %v453_v6 = vld [vmem:[#allocation9 + $0xa8] sm:$0xff]  ;;  %v452_v9 = vld [vmem:[#allocation9 + $0xa0] sm:$0xff]  ;;  %v440_v10 = vld [vmem:[#allocation9 + $0x58] sm:$0xff] }
  0x48   : > { %355 = vmatpush.msra.mxu1 %v290_v41  ;;  %398 = vmatpush.msra.mxu2 %v373_v43  ;;  %v451_v11 = vld [vmem:[#allocation9 + $0x98] sm:$0xff]  ;;  %v439_v12 = vld [vmem:[#allocation9 + $0x50] sm:$0xff]  ;;  %v438_v14 = vld [vmem:[#allocation9 + $0x48] sm:$0xff] }
  0x49   : > { %333 = vmatpush.msra.mxu0 %v308_v44  ;;  %471 = vmatpush.msra.mxu3 %v456_v60  ;;  %v450_v13 = vld [vmem:[#allocation9 + $0x90] sm:$0xff]  ;;  %v449_v15 = vld [vmem:[#allocation9 + $0x88] sm:$0xff]  ;;  %v448_v16 = vld [vmem:[#allocation9 + $0x80] sm:$0xff] }
  0x4a   : > { %356 = vmatpush.msra.mxu1 %v289_v45  ;;  %399 = vmatpush.msra.mxu2 %v372_v47  ;;  %v437_v17 = vld [vmem:[#allocation9 + $0x40] sm:$0xff]  ;;  %v436_v19 = vld [vmem:[#allocation9 + $0x38] sm:$0xff]  ;;  %v435_v21 = vld [vmem:[#allocation9 + $0x30] sm:$0xff] }
  0x4b   : > { %334 = vmatpush.msra.mxu0 %v307_v48  ;;  %472 = vmatpush.msra.mxu3 %v455_v63  ;;  %v525_v18 = vld [vmem:[#allocation9 + $0x160] sm:$0xff]  ;;  %v524_v20 = vld [vmem:[#allocation9 + $0x158] sm:$0xff]  ;;  %v523_v22 = vld [vmem:[#allocation9 + $0x150] sm:$0xff] }
  0x4c   : > { %357 = vmatpush.msra.mxu1 %v288_v50  ;;  %400 = vmatpush.msra.mxu2 %v371_v49  ;;  %v434_v23 = vld [vmem:[#allocation9 + $0x28] sm:$0xff]  ;;  %v433_v25 = vld [vmem:[#allocation9 + $0x20] sm:$0xff]  ;;  %v432_v28 = vld [vmem:[#allocation9 + $0x18] sm:$0xff] }
  0x4d   : > { %335 = vmatpush.msra.mxu0 %v306_v52  ;;  %473 = vmatpush.msra.mxu3 %v454_v2  ;;  %v522_v24 = vld [vmem:[#allocation9 + $0x148] sm:$0xff]  ;;  %v521_v26 = vld [vmem:[#allocation9 + $0x140] sm:$0xff]  ;;  %v520_v30 = vld [vmem:[#allocation9 + $0x138] sm:$0xff] }
  0x4e   : > { %358 = vmatpush.msra.mxu1 %v287_v53  ;;  %401 = vmatpush.msra.mxu2 %v370_v55  ;;  %v431_v31 = vld [vmem:[#allocation9 + $0x10] sm:$0xff]  ;;  %v430_v33 = vld [vmem:[#allocation9 + $0x8] sm:$0xff]  ;;  %v429_v35 = vld [vmem:[#allocation9] sm:$0xff] }
  0x4f   : > { %336 = vmatpush.msra.mxu0 %v305_v56  ;;  %402 = vmatmul.f32.vlgmr.msra.gmra.mxu2 %v367_v57  ;;  %v519_v32 = vld [vmem:[#allocation9 + $0x130] sm:$0xff]  ;;  %v518_v34 = vld [vmem:[#allocation9 + $0x128] sm:$0xff]  ;;  %v517_v36 = vld [vmem:[#allocation9 + $0x120] sm:$0xff] }
  0x50   : > { %359 = vmatpush.msra.mxu1 %v286_v58  ;;  %337 = vmatmul.f32.vlgmr.msra.gmra.mxu0 %v1119_v27  ;;  %v516_v37 = vld [vmem:[#allocation9 + $0x118] sm:$0xff]  ;;  %v515_v38 = vld [vmem:[#allocation9 + $0x110] sm:$0xff]  ;;  %v514_v39 = vld [vmem:[#allocation9 + $0x108] sm:$0xff] }
  0x51   : > { %360 = vmatmul.f32.vlgmr.msra.gmra.mxu1 %v284_v59  ;;  %487 = vmatpush.msrb.mxu0 %v444_v61  ;;  %v513_v40 = vld [vmem:[#allocation9 + $0x100] sm:$0xff]  ;;  %v796_v44 = vld [vmem:[%s1173_s2] ss:$0 sm:$0xff] }
  0x52   : > { %692 = vmatpush.msrb.mxu2 %v444_v61  ;;  %529 = vmatpush.msrb.mxu1 %v528_v62  ;;  %v797_v2 = vld [vmem:[%s1175_s4] ss:$0 sm:$0xff] }
  0x53   : > { %488 = vmatpush.msrb.mxu0 %v443_v0  ;;  %474 = vmatpush.msra.mxu3 %v453_v6 }
  0x54   : > { %693 = vmatpush.msrb.mxu2 %v443_v0  ;;  %530 = vmatpush.msrb.mxu1 %v527_v1 }
  0x55   : > { %489 = vmatpush.msrb.mxu0 %v442_v3  ;;  %475 = vmatpush.msra.mxu3 %v452_v9 }
  0x56   : > { %694 = vmatpush.msrb.mxu2 %v442_v3  ;;  %531 = vmatpush.msrb.mxu1 %v526_v4 }
  0x57   : > { %405 = vmatmul.f32.gmra.mxu2 %v368_v5  ;;  %490 = vmatpush.msrb.mxu0 %v441_v8 }
  0x58   : > { %340 = vmatmul.f32.gmra.mxu0 %v1122_v29  ;;  %695 = vmatpush.msrb.mxu2 %v441_v8 }
  0x59   : > { %363 = vmatmul.f32.gmra.mxu1 %v285_v7  ;;  %491 = vmatpush.msrb.mxu0 %v440_v10 }
  0x5a   : > { %476 = vmatpush.msra.mxu3 %v451_v11  ;;  %696 = vmatpush.msrb.mxu2 %v440_v10 }
  0x5b   : > { %492 = vmatpush.msrb.mxu0 %v439_v12  ;;  %532 = vmatpush.msrb.mxu1 %v525_v18 }
  0x5c   : > { %477 = vmatpush.msra.mxu3 %v450_v13  ;;  %697 = vmatpush.msrb.mxu2 %v439_v12 }
  0x5d   : > { %493 = vmatpush.msrb.mxu0 %v438_v14  ;;  %533 = vmatpush.msrb.mxu1 %v524_v20 }
  0x5e   : > { %698 = vmatpush.msrb.mxu2 %v438_v14  ;;  %478 = vmatpush.msra.mxu3 %v449_v15 }
  0x5f   : > { %494 = vmatpush.msrb.mxu0 %v437_v17  ;;  %534 = vmatpush.msrb.mxu1 %v523_v22 }
  0x60   : > { %479 = vmatpush.msra.mxu3 %v448_v16  ;;  %699 = vmatpush.msrb.mxu2 %v437_v17 }
  0x61   : > { %495 = vmatpush.msrb.mxu0 %v436_v19  ;;  %535 = vmatpush.msrb.mxu1 %v522_v24 }
  0x62   : > { %708 = vmatpush.msrb.mxu3 %v528_v62  ;;  %700 = vmatpush.msrb.mxu2 %v436_v19 }
  0x63   : > { %496 = vmatpush.msrb.mxu0 %v435_v21  ;;  %536 = vmatpush.msrb.mxu1 %v521_v26 }
  0x64   : > { %709 = vmatpush.msrb.mxu3 %v527_v1  ;;  %701 = vmatpush.msrb.mxu2 %v435_v21 }
  0x65   : > { %497 = vmatpush.msrb.mxu0 %v434_v23  ;;  %537 = vmatpush.msrb.mxu1 %v520_v30 }
  0x66   : > { %710 = vmatpush.msrb.mxu3 %v526_v4  ;;  %702 = vmatpush.msrb.mxu2 %v434_v23 }
  0x67   : > { %498 = vmatpush.msrb.mxu0 %v433_v25  ;;  %538 = vmatpush.msrb.mxu1 %v519_v32 }
  0x68   : > { %711 = vmatpush.msrb.mxu3 %v525_v18  ;;  %703 = vmatpush.msrb.mxu2 %v433_v25 }
  0x69   : > { %499 = vmatpush.msrb.mxu0 %v432_v28  ;;  %539 = vmatpush.msrb.mxu1 %v518_v34 }
  0x6a   : > { %712 = vmatpush.msrb.mxu3 %v524_v20  ;;  %704 = vmatpush.msrb.mxu2 %v432_v28 }
  0x6b   : > { %500 = vmatpush.msrb.mxu0 %v431_v31  ;;  %540 = vmatpush.msrb.mxu1 %v517_v36 }
  0x6c   : > { %713 = vmatpush.msrb.mxu3 %v523_v22  ;;  %705 = vmatpush.msrb.mxu2 %v431_v31 }
  0x6d   : > { %501 = vmatpush.msrb.mxu0 %v430_v33  ;;  %541 = vmatpush.msrb.mxu1 %v516_v37 }
  0x6e   : > { %714 = vmatpush.msrb.mxu3 %v522_v24  ;;  %706 = vmatpush.msrb.mxu2 %v430_v33 }
  0x6f   : > { %502 = vmatpush.msrb.mxu0 %v429_v35  ;;  %542 = vmatpush.msrb.mxu1 %v515_v38 }
  0x70   : > { %715 = vmatpush.msrb.mxu3 %v521_v26  ;;  %707 = vmatpush.msrb.mxu2 %v429_v35 }
  0x71   : > { %543 = vmatpush.msrb.mxu1 %v514_v39 }
  0x72   : > { %716 = vmatpush.msrb.mxu3 %v520_v30 }
  0x73   : > { %544 = vmatpush.msrb.mxu1 %v513_v40 }
  0x74   : > { %717 = vmatpush.msrb.mxu3 %v519_v32 }
  0x76   : > { %718 = vmatpush.msrb.mxu3 %v518_v34 }
  0x78   : > { %719 = vmatpush.msrb.mxu3 %v517_v36 }
  0x7a   : > { %720 = vmatpush.msrb.mxu3 %v516_v37 }
  0x7c   : > { %721 = vmatpush.msrb.mxu3 %v515_v38 }
  0x7e   : > { %722 = vmatpush.msrb.mxu3 %v514_v39 }
  0x80   : > { %723 = vmatpush.msrb.mxu3 %v513_v40 }
  0xcd   : > { %v338_v41 = vpop.f32.mrf.mxu0 }
  0xce   : > { %v361_v42 = vpop.f32.mrf.mxu1 }
  0xcf   : > { %v362_v43 = vadd.f32 %v361_v42, %v338_v41 }
  0xd2   : > { %v403_v45 = vpop.f32.mrf.mxu2 }
  0xd3   : > { %v409_v46 = vadd.f32 %v403_v45, %v362_v43 }
  0xd5   : > { %v415_v47 = vadd.f32 %v796_v44, %v409_v46  ;;  %v341_v48 = vpop.f32.mrf.mxu0 }
  0xd6   : > { %v364_v49 = vpop.f32.mrf.mxu1 }
  0xd7   : > { %vm417_vm0 = vcmp.gt.f32.partialorder %v415_v47, 0.0  ;;  %v419_v50 = vmul.f32 0.2, %v415_v47  ;;  %v365_v51 = vadd.f32 %v364_v49, %v341_v48 }
  0xd9   : > { %v421_v52 = vsel %vm417_vm0, %v415_v47, %v419_v50 }
  0xda   : > { %425 = vst [vmem:[#allocation3 + $0x1] sm:$0xff] %v421_v52  ;;  %v406_v53 = vpop.f32.mrf.mxu2  ;;  %480 = vmatmul.f32.vlgmr.msra.gmra.mxu3 %v421_v52 }
  0xdb   : > { %v410_v54 = vadd.f32 %v406_v53, %v365_v51 }
  0xdd   : > { %v416_v55 = vadd.f32 %v796_v44, %v410_v54 }
  0xdf   : > { %vm418_vm1 = vcmp.gt.f32.partialorder %v416_v55, 0.0  ;;  %v420_v56 = vmul.f32 0.2, %v416_v55 }
  0xe1   : > { %v422_v57 = vsel %vm418_vm1, %v416_v55, %v420_v56  ;;  %v427_v58 = vld [vmem:[#allocation3] sm:$0xff] }
  0xe2   : > { %426 = vst [vmem:[#allocation3 + $0x9] sm:$0xff] %v422_v57  ;;  %503 = vmatmul.f32.vlgmr.msrb.gmra.mxu0 %v427_v58  ;;  %483 = vmatmul.f32.gmra.mxu3 %v422_v57 }
  0xe9   : > { %v428_v59 = vld [vmem:[#allocation3 + $0x8] sm:$0xff] }
  0xea   : > { %v510_v60 = vld [vmem:[#allocation3 + $0x2] sm:$0xff]  ;;  %v511_v61 = vld [vmem:[#allocation3 + $0xa] sm:$0xff]  ;;  %506 = vmatmul.f32.vlgmr.msrb.gmra.mxu2 %v428_v59 }
  0xeb   : > { %545 = vmatmul.f32.vlgmr.msrb.gmra.mxu1 %v510_v60  ;;  %548 = vmatmul.f32.vlgmr.msrb.gmra.mxu3 %v511_v61 }
 0x15d   : > { %v481_v62 = vpop.f32.mrf.mxu3 }
 0x15f   : > { %v504_v63 = vpop.f32.mrf.mxu0 }
 0x160   : > { %v505_v1 = vadd.f32 %v504_v63, %v481_v62 }
 0x165   : > { %v484_v0 = vpop.f32.mrf.mxu3 }
 0x168   : > { %v546_v3 = vpop.f32.mrf.mxu1 }
 0x169   : > { %v552_v4 = vadd.f32 %v546_v3, %v505_v1 }
 0x16b   : > { %v558_v5 = vadd.f32 %v797_v2, %v552_v4 }
 0x16d   : > { %v560_v6 = vadd.f32 %v558_v5, %v1119_v27  ;;  %v507_v7 = vpop.f32.mrf.mxu2 }
 0x16e   : > { %v508_v8 = vadd.f32 %v507_v7, %v484_v0  ;;  %v549_v9 = vpop.f32.mrf.mxu3 }
 0x16f   : > { %562 = vst [vmem:[%s277_s30] sm:$0xff] %v560_v6 }
 0x170   : > { %v553_v10 = vadd.f32 %v549_v9, %v508_v8 }
 0x172   : > { %v559_v11 = vadd.f32 %v797_v2, %v553_v10 }
 0x174   : > { %v561_v12 = vadd.f32 %v559_v11, %v1122_v29 }
 0x176   : > { %563 = vst [vmem:[%s277_s30 + $0x8] sm:$0xff] %v561_v12 }
 0x177   : > { %915 = shalt.err (!%p912_p10)
}
 0x178   : > { %s965_s8 = smov 128   ;;  %s966_s9 = smov 8  }
 0x179   : > { %734 = dma.vmem_to_hbm [thread:$0]  (%p1069_p3), %s578_s6, 256, %s580_s7, %s565_s22, %s965_s8, %s965_s8, %s966_s9  }
 0x17a PF: > { %s594_s12 = sand.u32 1, %s946_s18   ;;  %p1184_p12 = scmp.ge.s32.totalorder %s958_s21, 2 }
 0x17b   : > { %s595_s13 = scalar_lea.sflag [#allocation6], %s594_s12 }
 0x17c   : > { %p748_p13 = pnand %p1184_p12, %p1032_p6 }
 0x17e   : > { %p749_p0 = pneg %p748_p13 }
 0x180   : > { %941 = dma.done.wait (%p749_p0), %s595_s13, 256  }
 0x181   : > { %943 = vsyncadd (%p749_p0), %s595_s13, 4294967040  ;;  %p19_p5 = scmp.ge.s32.totalorder %s1059_s14, 4   ;;  %s1185_s18 = smov %s950_s19 }
 0x182   : > { %s1186_s19 = smov %s954_s20  ;;  %s1187_s20 = smov %s1075_s23 }
 0x183   : > { %s1188_s21 = smov %s1059_s14  ;;  %21 = sbr.rel (!%p19_p5) target bundleno = 6 (0x6), region = 97 }
 0x188   :  { %601 = vsyncpa [#allocation5], 1 }
 0x189   :  { %603 = vsyncpa [#allocation5 + $0x1], 1 }
 0x18a   :  { %604 = vsyncpa [#allocation8], 1 }
 0x18b   :  { %605 = vsyncpa [#allocation6], 1 }
 0x18c   :  { %607 = vsyncpa [#allocation6 + $0x1], 1 }

</bundles_post_ra>
